<compile_context>
chip_gen: v6e
topology: v6e:2x2x1
jax: 0.10.0
libtpu: 0.0.40
codegen_flags: <defaults>
</compile_context>

<pallas_src>
import functools

import jax
import jax.numpy as jnp
from jax.experimental import pallas as pl
from jax.experimental.pallas import tpu as pltpu

GAMMA = 2.0
IGNORE_INDEX = -100
_MiB = 1024 * 1024


def _round_up(x, m):
    return (x + m - 1) // m * m


def _sublane_multiple(dtype):
    # native sublane packing: f32 -> 8 rows, bf16 -> 16, int8/fp8 -> 32
    return max(8, 32 // jnp.dtype(dtype).itemsize)


def _vmem_limit_bytes():
    """Scoped-VMEM request per generation: ~3/4 of physical, capped at 64 MiB.
    v5e/v6e (128 MiB physical) -> 64 MiB; v7x (64 MiB physical) -> 48 MiB."""
    try:
        physical = int(pltpu.get_tpu_info().vmem_capacity_bytes)
    except Exception:
        physical = 64 * _MiB          # conservative default (v7x per-core VMEM)
    return min(64 * _MiB, (physical * 3) // 4)


def _static_pow(x, gamma):
    """x ** gamma for x >= 0 with a static exponent, avoiding EUP pow for
    small integer gamma (explicit multiplies run on the VPU)."""
    g = float(gamma)
    if g == int(g) and 0 <= int(g) <= 8:
        gi = int(g)
        if gi == 0:
            return jnp.ones_like(x)
        out = x
        for _ in range(gi - 1):
            out = out * x
        return out
    # non-integer gamma (rare): guarded pow, clamp keeps log() finite
    return jnp.where(x > 0.0, jnp.exp(g * jnp.log(jnp.maximum(x, 1e-30))), 0.0)


def focal_loss_kernel(x_ref, t_ref, num_ref, den_ref, *,
                      gamma, ignore_index, n_rows, tile_rows):
    # x_ref: [TN, C] logits block (stored dtype), t_ref: [TN, 1] int32 targets
    # num_ref / den_ref: [1, 1] f32 per-tile partial outputs (independent per
    # grid step -> the row-tile axis can be "parallel").
    i = pl.program_id(0)

    xs = x_ref[...]                               # [TN, C] stored dtype
    t = t_ref[...]                                # [TN, 1] int32

    # Row max in the stored dtype (exact for bf16 data); fold the f32 upcast
    # into the subtraction so only one [TN, C] f32 temporary is materialized.
    m = jnp.max(xs, axis=1, keepdims=True)                       # [TN, 1]
    z = xs.astype(jnp.float32) - m.astype(jnp.float32)           # [TN, C] f32
    lse = jnp.log(jnp.sum(jnp.exp(z), axis=1, keepdims=True))    # [TN, 1]

    # Gather z at the target column via a one-hot compare (no dynamic lane
    # gather); all remaining focal math is on the narrow [TN, 1] column.
    col = jax.lax.broadcasted_iota(jnp.int32, z.shape, 1)        # [TN, C]
    z_t = jnp.sum(jnp.where(col == t, z, 0.0), axis=1, keepdims=True)

    logpt_t = z_t - lse                           # [TN, 1]
    pt_t = jnp.exp(logpt_t)
    one_minus_pt = jnp.maximum(1.0 - pt_t, 0.0)   # clamp rounding to >= 0
    focal_t = _static_pow(one_minus_pt, gamma) * logpt_t

    # Mask ignore_index rows and rows past the true N (partial last tile).
    rows = jax.lax.broadcasted_iota(jnp.int32, t.shape, 0) + i * tile_rows
    valid = (t != ignore_index) & (rows < n_rows)

    num_ref[...] = jnp.sum(jnp.where(valid, focal_t, 0.0),
                           axis=0, keepdims=True)
    den_ref[...] = jnp.sum(valid.astype(jnp.float32),
                           axis=0, keepdims=True)


def focal_loss(logits, target, gamma=GAMMA, ignore_index=IGNORE_INDEX,
               tile_rows=None):
    """logits: [N, C] float (f32 or bf16), target: [N] int. Scalar f32 loss."""
    n, c = logits.shape
    t2d = target.reshape(n, 1).astype(jnp.int32)
    itemsize = jnp.dtype(logits.dtype).itemsize
    mult = _sublane_multiple(logits.dtype)

    vmem_limit = _vmem_limit_bytes()
    if tile_rows is None:
        # Resident bytes per tile row (what is actually live in VMEM):
        #   2x double-buffered logits rows
        # + 2x 128-lane-padded int32 target rows (512 B each)
        # + ~3 tile-wide f32 temporaries (z, exp(z), one-hot select)
        bytes_per_row = 2 * c * itemsize + 2 * 128 * 4 + 3 * c * 4
        budget = (vmem_limit * 3) // 4            # headroom for compiler scratch
        tile_rows = max(1, budget // bytes_per_row)
    tile_rows = min(int(tile_rows), _round_up(n, mult))
    tile_rows = max(mult, _round_up(tile_rows, mult))

    num_tiles = (n + tile_rows - 1) // tile_rows

    kernel = functools.partial(
        focal_loss_kernel, gamma=gamma, ignore_index=ignore_index,
        n_rows=n, tile_rows=tile_rows)

    cost = pl.CostEstimate(
        flops=int(6 * n * c),                       # max/sub/cmp/select/sums
        transcendentals=int(n * c + 2 * n),         # exp per element + row log/exp
        bytes_accessed=int(n * c * itemsize + 4 * n + 8 * num_tiles),
    )

    num_parts, den_parts = pl.pallas_call(
        kernel,
        out_shape=(jax.ShapeDtypeStruct((num_tiles, 1), jnp.float32),
                   jax.ShapeDtypeStruct((num_tiles, 1), jnp.float32)),
        grid=(num_tiles,),
        in_specs=[
            pl.BlockSpec((tile_rows, c), lambda i: (i, 0)),
            pl.BlockSpec((tile_rows, 1), lambda i: (i, 0)),
        ],
        out_specs=(pl.BlockSpec((1, 1), lambda i: (i, 0)),
                   pl.BlockSpec((1, 1), lambda i: (i, 0))),
        compiler_params=pltpu.CompilerParams(
            # Per-tile partials are independent, so the row-tile axis is
            # "parallel": on v7x both TensorCores stream half the HBM traffic.
            dimension_semantics=("parallel",),
            vmem_limit_bytes=vmem_limit,
        ),
        cost_estimate=cost,
    )(logits, t2d)

    # Tiny final reduction outside the kernel (also lets XLA sum pairwise).
    num = jnp.sum(num_parts)
    den = jnp.sum(den_parts)
    # den == 0 (every target ignored) yields NaN, matching F.nll_loss.
    return -num / den


def focal_loss_ref(logits, target, gamma=GAMMA, ignore_index=IGNORE_INDEX):
    # pure-JAX reference mirroring the PyTorch module
    logpt = jax.nn.log_softmax(logits.astype(jnp.float32), axis=1)
    pt = jnp.exp(logpt)
    focal = (1.0 - pt) ** gamma * logpt
    valid = target != ignore_index
    safe_t = jnp.where(valid, target, 0)
    sel = jnp.take_along_axis(focal, safe_t[:, None], axis=1)[:, 0]
    num = jnp.sum(jnp.where(valid, sel, 0.0))
    den = jnp.sum(valid.astype(jnp.float32))
    return -num / den


if __name__ == "__main__":
    key = jax.random.PRNGKey(0)
    k_x, k_t, k_x2, k_t2 = jax.random.split(key, 4)

    # test 1: small f32 case, single tile, with an ignore_index row
    N, C = 8, 16
    x = jax.random.normal(k_x, (N, C), dtype=jnp.float32)
    t = jax.random.randint(k_t, (N,), 0, C, dtype=jnp.int32)
    t = t.at[0].set(IGNORE_INDEX)

    loss = focal_loss(x, t)
    jax.block_until_ready(loss)
    ref = focal_loss_ref(x, t)
    assert jnp.allclose(loss, ref, atol=1e-5, rtol=1e-5), (loss, ref)

    # test 2: bf16 logits, multiple row tiles + partial last tile + ignore rows
    N2, C2 = 40, 16
    x2 = jax.random.normal(k_x2, (N2, C2), dtype=jnp.float32).astype(jnp.bfloat16)
    t2 = jax.random.randint(k_t2, (N2,), 0, C2, dtype=jnp.int32)
    t2 = t2.at[3].set(IGNORE_INDEX)
    t2 = t2.at[37].set(IGNORE_INDEX)

    loss2 = focal_loss(x2, t2, tile_rows=16)   # grid of 3 tiles, last partial
    jax.block_until_ready(loss2)
    ref2 = focal_loss_ref(x2, t2)
    assert jnp.allclose(loss2, ref2, atol=1e-4, rtol=1e-4), (loss2, ref2)

    print("KERNEL_OK")
</pallas_src>

<mosaic_0001>
module attributes {stable_mosaic.version = 11 : i64} {
  func.func @focal_loss_kernel(%arg0: i32, %arg1: memref<8x16xf32, #tpu.memory_space<vmem>>, %arg2: memref<8x1xi32, #tpu.memory_space<vmem>>, %arg3: memref<1x1xf32, #tpu.memory_space<vmem>>, %arg4: memref<1x1xf32, #tpu.memory_space<vmem>>) attributes {dimension_semantics = [#tpu.dimension_semantics<parallel>], iteration_bounds = array<i64: 1>, scalar_prefetch = 0 : i64, scratch_operands = 0 : i64, tpu.core_type = #tpu.core_type<tc>, window_params = [{transform_indices = @transform_0, window_bounds = array<i64: 8, 16>}, {transform_indices = @transform_1, window_bounds = array<i64: 8, 1>}, {transform_indices = @transform_2, window_bounds = array<i64: 1, 1>}, {transform_indices = @transform_3, window_bounds = array<i64: 1, 1>}]} {
    %c0 = arith.constant 0 : index
    %c0_0 = arith.constant 0 : index
    %0 = vector.load %arg1[%c0, %c0_0] : memref<8x16xf32, #tpu.memory_space<vmem>>, vector<8x16xf32>
    %c0_1 = arith.constant 0 : index
    %c0_2 = arith.constant 0 : index
    %1 = vector.load %arg2[%c0_1, %c0_2] : memref<8x1xi32, #tpu.memory_space<vmem>>, vector<8x1xi32>
    %cst = arith.constant dense<0xFF800000> : vector<8xf32>
    %2 = vector.multi_reduction <maximumf>, %0, %cst [1] : vector<8x16xf32> to vector<8xf32>
    %3 = vector.shape_cast %2 : vector<8xf32> to vector<8x1xf32>
    %4 = vector.broadcast %3 : vector<8x1xf32> to vector<8x16xf32>
    %5 = arith.subf %0, %4 : vector<8x16xf32>
    %6 = math.exp %5 : vector<8x16xf32>
    %cst_3 = arith.constant dense<0.000000e+00> : vector<8xf32>
    %7 = vector.multi_reduction <add>, %6, %cst_3 [1] : vector<8x16xf32> to vector<8xf32>
    %8 = vector.shape_cast %7 : vector<8xf32> to vector<8x1xf32>
    %9 = math.log %8 : vector<8x1xf32>
    %10 = tpu.iota {dimensions = array<i32: 1>} : vector<8x16xi32>
    %11 = vector.broadcast %1 : vector<8x1xi32> to vector<8x16xi32>
    %12 = arith.cmpi eq, %10, %11 : vector<8x16xi32>
    %cst_4 = arith.constant 0.000000e+00 : f32
    %13 = vector.broadcast %cst_4 : f32 to vector<8x16xf32>
    %14 = arith.select %12, %5, %13 : vector<8x16xi1>, vector<8x16xf32>
    %cst_5 = arith.constant dense<0.000000e+00> : vector<8xf32>
    %15 = vector.multi_reduction <add>, %14, %cst_5 [1] : vector<8x16xf32> to vector<8xf32>
    %16 = vector.shape_cast %15 : vector<8xf32> to vector<8x1xf32>
    %17 = arith.subf %16, %9 : vector<8x1xf32>
    %18 = math.exp %17 : vector<8x1xf32>
    %cst_6 = arith.constant 1.000000e+00 : f32
    %19 = vector.broadcast %cst_6 : f32 to vector<8x1xf32>
    %20 = arith.subf %19, %18 : vector<8x1xf32>
    %cst_7 = arith.constant 0.000000e+00 : f32
    %21 = vector.broadcast %cst_7 : f32 to vector<8x1xf32>
    %22 = arith.maximumf %20, %21 : vector<8x1xf32>
    %23 = arith.mulf %22, %22 : vector<8x1xf32>
    %24 = arith.mulf %23, %17 : vector<8x1xf32>
    %25 = tpu.iota {dimensions = array<i32: 0>} : vector<8x1xi32>
    %c8_i32 = arith.constant 8 : i32
    %26 = arith.muli %arg0, %c8_i32 : i32
    %27 = vector.broadcast %26 : i32 to vector<8x1xi32>
    %28 = arith.addi %25, %27 : vector<8x1xi32>
    %c-100_i32 = arith.constant -100 : i32
    %29 = vector.broadcast %c-100_i32 : i32 to vector<8x1xi32>
    %30 = arith.cmpi ne, %1, %29 : vector<8x1xi32>
    %c8_i32_8 = arith.constant 8 : i32
    %31 = vector.broadcast %c8_i32_8 : i32 to vector<8x1xi32>
    %32 = arith.cmpi slt, %28, %31 : vector<8x1xi32>
    %33 = arith.andi %30, %32 : vector<8x1xi1>
    %cst_9 = arith.constant 0.000000e+00 : f32
    %34 = vector.broadcast %cst_9 : f32 to vector<8x1xf32>
    %35 = arith.select %33, %24, %34 : vector<8x1xi1>, vector<8x1xf32>
    %cst_10 = arith.constant dense<0.000000e+00> : vector<1xf32>
    %36 = vector.multi_reduction <add>, %35, %cst_10 [0] : vector<8x1xf32> to vector<1xf32>
    %37 = vector.shape_cast %36 : vector<1xf32> to vector<1x1xf32>
    %c0_11 = arith.constant 0 : index
    %c0_12 = arith.constant 0 : index
    %38 = vector.load %arg3[%c0_11, %c0_12] : memref<1x1xf32, #tpu.memory_space<vmem>>, vector<1x1xf32>
    tpu.vector_store %arg3[%c0_11, %c0_12], %37 {strides = array<i32>} : memref<1x1xf32, #tpu.memory_space<vmem>>, vector<1x1xf32>,
    %39 = arith.extui %33 : vector<8x1xi1> to vector<8x1xi32>
    %40 = arith.sitofp %39 : vector<8x1xi32> to vector<8x1xf32>
    %cst_13 = arith.constant dense<0.000000e+00> : vector<1xf32>
    %41 = vector.multi_reduction <add>, %40, %cst_13 [0] : vector<8x1xf32> to vector<1xf32>
    %42 = vector.shape_cast %41 : vector<1xf32> to vector<1x1xf32>
    %c0_14 = arith.constant 0 : index
    %c0_15 = arith.constant 0 : index
    %43 = vector.load %arg4[%c0_14, %c0_15] : memref<1x1xf32, #tpu.memory_space<vmem>>, vector<1x1xf32>
    tpu.vector_store %arg4[%c0_14, %c0_15], %42 {strides = array<i32>} : memref<1x1xf32, #tpu.memory_space<vmem>>, vector<1x1xf32>,
    return
  }
  func.func @transform_0(%arg0: i32) -> (i32, i32) {
    %c0_i32 = arith.constant 0 : i32
    %c0_i32_0 = arith.constant 0 : i32
    return %arg0, %c0_i32 : i32, i32
  }
  func.func @transform_1(%arg0: i32) -> (i32, i32) {
    %c0_i32 = arith.constant 0 : i32
    %c0_i32_0 = arith.constant 0 : i32
    return %arg0, %c0_i32 : i32, i32
  }
  func.func @transform_2(%arg0: i32) -> (i32, i32) {
    %c0_i32 = arith.constant 0 : i32
    %c0_i32_0 = arith.constant 0 : i32
    return %arg0, %c0_i32 : i32, i32
  }
  func.func @transform_3(%arg0: i32) -> (i32, i32) {
    %c0_i32 = arith.constant 0 : i32
    %c0_i32_0 = arith.constant 0 : i32
    return %arg0, %c0_i32 : i32, i32
  }
}

</mosaic_0001>

<bundles_post_ra>
// kernel: tpu_custom_call.1
= control target key start
LH: loop header
LB: loop body
LE: loop exit
PB: predicated region body
PF: predicated region fallthrough
CT: control target
= control target key end

     0   :  { %9 = vsyncpa [#allocation3], 0  ;;  %vm17_vm0 = vcmask 130048   ;;  %v159_v2 = vmov 0   ;;  %s204_s0 = inlined_call_operand.vmem [shape: f32[8,16], index: 0, kind: input, shape index: {}]   ;;  %s205_s1 = inlined_call_operand.vmem [shape: s32[8,1], index: 1, kind: input, shape index: {}]   ;;  %s206_s2 = inlined_call_operand.hbm [shape: f32[1,1], index: 2, kind: output, shape index: {0}]   ;;  %s207_s3 = inlined_call_operand.hbm [shape: f32[1,1], index: 3, kind: output, shape index: {1}]  }
   0x1   :  { %v15_v0 = vld [vmem:[%s204_s0] sm:$0xff]  ;;  %108 = vset.pattern.permute.xlu0 %v159_v2 }
   0x2   :  { %v18_v1 = vsel %vm17_vm0, %v15_v0, -inf }
   0x3   :  { %10 = vsyncpa [#allocation5], 0  ;;  %19 = vmax.xlane.f32.xlu0 %v18_v1  ;;  %v16_v3 = vld [vmem:[%s205_s1] sm:$0xff]  ;;  %v29_v7 = vlaneseq  ;;  %vm55_vm3 = vcmask 7168   ;;  %v160_v14 = vmov 0.0   ;;  %vm63_vm4 = vcmask 0  }
   0x4   :  { %vm51_vm2 = vcmp.ne.s32.totalorder %v16_v3, 4294967196  ;;  %s161_s0 = smov [#allocation4]  }
   0x5   :  { %v30_v8 = vand.u32 127, %v29_v7  ;;  %v103_v15 = vsel %vm51_vm2, 1.0, %v160_v14  ;;  %s91_s1 = sshll.u32 %s161_s0, 4  ;;  %s92_s1 = int_to_ptr.vmem [resolvable:$true] %s91_s1 }
   0x6   :  { %v67_v16 = vsel %vm55_vm3, %v103_v15, 0.0  ;;  %s115_s16 = scalar_lea.vmem %s92_s1, 16  ;;  %s119_s17 = scalar_lea.vmem %s92_s1, 32 }
   0x7   :  { %v68_v17 = vrot.slane %v67_v16, 4  ;;  %p116_p0 = scmp.ne.s32.totalorder %s92_s1, %s115_s16  ;;  %p120_p1 = scmp.lt.s32.totalorder %s92_s1, %s92_s1 }
   0x8   :  { %p121_p2 = scmp.lt.s32.totalorder %s119_s17, %s115_s16 }
   0x9   :  { %v69_v18 = vadd.f32 %v68_v17, %v67_v16 }
   0xa   :  { %p122_p3 = por %p121_p2, %p120_p1 }
   0xb   :  { %v70_v19 = vrot.slane %v69_v18, 2 }
   0xc   :  { %p123_p4 = pnand %p122_p3, %p116_p0 }
   0xd   :  { %v71_v20 = vadd.f32 %v70_v19, %v69_v18 }
   0xf   :  { %v72_v21 = vrot.slane %v71_v20, 1 }
  0x11   :  { %v73_v22 = vadd.f32 %v72_v21, %v71_v20 }
  0x13   :  { %74 = vst.msk [vmem:[#allocation4] sm:$0x1] %vm63_vm4, %v73_v22 }
  0x19   :  { %32 = vperm.xlu0 %108, %v16_v3  }
  0x8c   :  { %v20_v4 = vpop.xlane.xlu0 %19 }
  0x8d   :  { %v21_v5 = vsub.f32 %v15_v0, %v20_v4 }
  0x8f   :  { %v22_v6 = vmul.f32 1.442695, %v21_v5 }
  0x91   :  { %109 = vpow2.f32 %v22_v6 }
  0x94   :  { %v33_v9 = vpop.permute.xlu0 %32 }
  0x95   :  { %vm34_vm1 = vcmp.eq.s32.totalorder %v30_v8, %v33_v9 }
  0x96   :  { %v35_v12 = vsel %vm34_vm1, %v21_v5, 0.0 }
  0x97   :  { %v36_v13 = vsel %vm17_vm0, %v35_v12, 0.0 }
  0x9e   :  { %v110_v10 = vpop.eup %109 }
  0x9f   :  { %v24_v11 = vsel %vm17_vm0, %v110_v10, 0.0 }
  0xa0   :  { %25 = vadd.xlane.f32.xlu1 %v24_v11 }
  0xa4   :  { %37 = vadd.xlane.f32.xlu1 %v36_v13 }
  0xa5   :  { %126 = shalt.err (!%p123_p4)
}
  0xa6   :  { %94 = dma.vmem_to_hbm [thread:$0]  %s92_s1, 16, %s207_s3, [#allocation5]  }
  0xa7   :  { %s162_s3 = smov [#allocation2]  }
  0xa8   :  { %s81_s20 = sshll.u32 %s162_s3, 4  ;;  %s82_s20 = int_to_ptr.vmem [resolvable:$true] %s81_s20 }
  0xa9   :  { %s135_s21 = scalar_lea.vmem %s82_s20, 16  ;;  %s139_s22 = scalar_lea.vmem %s82_s20, 32 }
  0xaa   :  { %p136_p5 = scmp.ne.s32.totalorder %s82_s20, %s135_s21  ;;  %p140_p6 = scmp.lt.s32.totalorder %s82_s20, %s82_s20 }
  0xab   :  { %p141_p7 = scmp.lt.s32.totalorder %s139_s22, %s135_s21 }
  0xad   :  { %p142_p8 = por %p141_p7, %p140_p6 }
  0xaf   :  { %p143_p9 = pnand %p142_p8, %p136_p5 }
 0x129   :  { %v26_v23 = vpop.xlane.xlu1 %25 }
 0x12a   :  { %111 = vlog2.f32 %v26_v23 }
 0x12d   :  { %v38_v26 = vpop.xlane.xlu1 %37 }
 0x137   :  { %v112_v24 = vpop.eup %111 }
 0x138   :  { %v28_v25 = vmul.f32 0.6931472, %v112_v24 }
 0x13a   :  { %v39_v27 = vsub.f32 %v38_v26, %v28_v25 }
 0x13c   :  { %v40_v28 = vmul.f32 1.442695, %v39_v27 }
 0x13e   :  { %113 = vpow2.f32 %v40_v28 }
 0x14b   :  { %v114_v29 = vpop.eup %113 }
 0x14c   :  { %v42_v30 = vsub.f32 1.0, %v114_v29 }
 0x14e   :  { %v43_v31 = vmax.f32 %v42_v30, 0.0 }
 0x150   :  { %v44_v32 = vmul.f32 %v43_v31, %v43_v31 }
 0x152   :  { %v45_v33 = vmul.f32 %v44_v32, %v39_v27 }
 0x154   :  { %v54_v34 = vsel %vm51_vm2, %v45_v33, 0.0 }
 0x155   :  { %v56_v35 = vsel %vm55_vm3, %v54_v34, 0.0 }
 0x156   :  { %v57_v36 = vrot.slane %v56_v35, 4 }
 0x158   :  { %v58_v37 = vadd.f32 %v57_v36, %v56_v35 }
 0x15a   :  { %v59_v38 = vrot.slane %v58_v37, 2 }
 0x15c   :  { %v60_v39 = vadd.f32 %v59_v38, %v58_v37 }
 0x15e   :  { %v61_v40 = vrot.slane %v60_v39, 1 }
 0x160   :  { %v62_v41 = vadd.f32 %v61_v40, %v60_v39 }
 0x162   :  { %64 = vst.msk [vmem:[#allocation2] sm:$0x1] %vm63_vm4, %v62_v41 }
 0x163   :  { %146 = shalt.err (!%p143_p9)
}
 0x164   :  { %84 = dma.vmem_to_hbm [thread:$0]  %s82_s20, 16, %s206_s2, [#allocation3]  }
 0x165   :  { %155 = dma.done.wait [#allocation3], 16  }
 0x166   :  { %156 = vsyncadd [#allocation3], 4294967280 }
 0x167   :  { %157 = dma.done.wait [#allocation5], 16  }
 0x168   :  { %158 = vsyncadd [#allocation5], 4294967280 }
 0x169   :  { %101 = vsyncpa [#allocation3], 1 }
 0x16a   :  { %102 = vsyncpa [#allocation5], 1 }

</bundles_post_ra>
